<compile_context>
chip_gen: v5e
topology: v5e:2x2
jax: 0.10.0
libtpu: 0.0.40
codegen_flags: <defaults>
</compile_context>

<pallas_src>
import functools

import jax
import jax.numpy as jnp
from jax.experimental import pallas as pl
from jax.experimental.pallas import tpu as pltpu

_LANE = 128      # vreg lane width: last dim should be a multiple of this
_SUBLANE = 8     # vreg sublane count: second-to-last dim multiple of this

_VMEM_BUDGET = 40 << 20   # conservative working-set target (fits v7x's 64 MiB)
_VMEM_FLOOR = 32 << 20
_VMEM_CEIL = 64 << 20


def _round_up(x, m):
    return ((x + m - 1) // m) * m


def _pad2d(a, rows, cols):
    pr, pc = rows - a.shape[0], cols - a.shape[1]
    if pr == 0 and pc == 0:
        return a
    return jnp.pad(a, ((0, pr), (0, pc)))


def _device_traits():
    """Return (tensorcores_per_chip, mxu_row_alignment) with safe fallbacks."""
    try:
        kind = jax.devices()[0].device_kind.lower()
    except Exception:
        kind = ""
    if "v5 lite" in kind or "v5lite" in kind or "v5e" in kind:
        return 1, 128          # v5e: 1 TC/chip, 4x128x128 MXU
    if "v6" in kind:
        return 1, 256          # v6e: 1 TC/chip, 2x256x256 MXU
    if "v7" in kind or "7x" in kind:
        return 2, 256          # v7x: 2 TC/chip, 2x256x256 MXU
    return 1, 128              # unknown: conservative


@functools.lru_cache(maxsize=None)
def _buffered_one_supported():
    """Probe once whether pipeline_mode=pl.Buffered(1) is accepted end-to-end."""
    if not hasattr(pl, "Buffered"):
        return False
    try:
        def k(x_ref, o_ref):
            o_ref[...] = x_ref[...]

        x = jnp.zeros((_SUBLANE, _LANE), jnp.float32)
        out = pl.pallas_call(
            k,
            out_shape=jax.ShapeDtypeStruct((_SUBLANE, _LANE), jnp.float32),
            grid=(1,),
            in_specs=[pl.BlockSpec((_SUBLANE, _LANE), lambda i: (0, 0),
                                   pipeline_mode=pl.Buffered(1))],
            out_specs=pl.BlockSpec((_SUBLANE, _LANE), lambda i: (0, 0)),
        )(x)
        jax.block_until_ready(out)
        return True
    except Exception:
        return False


# ----------------------------------------------------------------------------
# Kernels
# ----------------------------------------------------------------------------
def _mlp_fused_kernel(x_ref, w1_ref, b1_ref, w2_ref, b2_ref, o_ref):
    """ReLU(x @ W1 + b1) @ W2 + b2 for one lane-dense batch tile."""
    h = jnp.dot(x_ref[...], w1_ref[...], preferred_element_type=jnp.float32)
    h = jnp.maximum(h + b1_ref[...], 0.0)          # b1 is (1, hid) -> broadcast
    if w2_ref.dtype != jnp.float32:                # deliberate low-precision path
        h = h.astype(w2_ref.dtype)
    out = jnp.dot(h, w2_ref[...], preferred_element_type=jnp.float32)
    o_ref[...] = (out + b2_ref[...]).astype(o_ref.dtype)


def _mlp_ktiled_kernel(x_ref, w1_ref, b1_ref, w2_ref, b2_ref, o_ref, acc_ref):
    """Same computation, with the hidden dim streamed along grid axis 1."""
    k = pl.program_id(1)

    @pl.when(k == 0)
    def _():
        acc_ref[...] = jnp.zeros_like(acc_ref)

    h = jnp.dot(x_ref[...], w1_ref[...], preferred_element_type=jnp.float32)
    h = jnp.maximum(h + b1_ref[...], 0.0)
    if w2_ref.dtype != jnp.float32:
        h = h.astype(w2_ref.dtype)
    acc_ref[...] += jnp.dot(h, w2_ref[...], preferred_element_type=jnp.float32)

    @pl.when(k == pl.num_programs(1) - 1)
    def _():
        o_ref[...] = (acc_ref[...] + b2_ref[...]).astype(o_ref.dtype)


# ----------------------------------------------------------------------------
# Tiling / VMEM budgeting
# ----------------------------------------------------------------------------
def _vmem_bytes(bt, in_p, hid_blk, out_p, cbytes, obytes, *, ktiled, single_buf_w):
    wbuf = 2 if ktiled else (1 if single_buf_w else 2)
    e = 2 * bt * in_p * cbytes                       # x tile (double-buffered)
    e += 2 * bt * out_p * obytes                     # out tile (double-buffered)
    e += wbuf * (in_p * hid_blk + hid_blk * out_p) * cbytes   # W1, W2
    e += wbuf * hid_blk * 4                          # b1 (f32)
    e += (1 if single_buf_w else 2) * out_p * 4      # b2 (f32, constant index)
    e += bt * hid_blk * 4                            # f32 intermediate h
    if ktiled:
        e += bt * out_p * 4                          # f32 output accumulator
    return e


def _select_tiling(B8, in_p, hid_p, out_p, cbytes, obytes,
                   num_tc, mxu_rows, single_buf):
    # Batch tile: single tile on 1-TC chips (v5e/v6e); split across the two
    # TensorCores on v7x; align large tiles to the MXU row count.
    if num_tc > 1 and B8 >= 2 * _SUBLANE:
        want = _round_up(pl.cdiv(B8, num_tc), _SUBLANE)
    else:
        want = B8
    align = mxu_rows if want > mxu_rows else _SUBLANE
    batch_tile = min(1024, _round_up(want, align))

    hid_tile = None   # None -> fused kernel (no hidden tiling)

    def fits(bt, ht):
        return _vmem_bytes(bt, in_p, ht if ht is not None else hid_p, out_p,
                           cbytes, obytes, ktiled=ht is not None,
                           single_buf_w=single_buf) <= _VMEM_BUDGET

    while not fits(batch_tile, hid_tile):
        if hid_tile is None and hid_p > _LANE:
            hid_tile = hid_p                     # switch to hidden (K) tiling
        if hid_tile is not None and hid_tile > _LANE:
            hid_tile = _round_up(hid_tile // 2, _LANE)
        elif batch_tile > _SUBLANE:
            batch_tile = max(_SUBLANE, _round_up(batch_tile // 2, _SUBLANE))
        else:
            break                                # rely on vmem_limit headroom
    return batch_tile, hid_tile


# ----------------------------------------------------------------------------
# pallas_call wrapper
# ----------------------------------------------------------------------------
def _pallas_mlp(x_p, w1_p, b1_p, w2_p, b2_p, *, batch_tile, hid_tile, out_dtype,
                single_buffer_consts, vmem_limit):
    B_pad, in_p = x_p.shape
    hid_p = w1_p.shape[1]
    out_p = w2_p.shape[1]
    n_b = B_pad // batch_tile

    def const_spec(shape, index_map):
        # Weights/biases with a constant index_map never change across grid
        # steps -> single-buffer them to halve their VMEM footprint.
        if single_buffer_consts:
            return pl.BlockSpec(shape, index_map, pipeline_mode=pl.Buffered(1))
        return pl.BlockSpec(shape, index_map)

    if hid_tile is None:
        grid = (n_b,)
        in_specs = [
            pl.BlockSpec((batch_tile, in_p), lambda i: (i, 0)),
            const_spec((in_p, hid_p), lambda i: (0, 0)),
            const_spec((1, hid_p), lambda i: (0, 0)),
            const_spec((hid_p, out_p), lambda i: (0, 0)),
            const_spec((1, out_p), lambda i: (0, 0)),
        ]
        out_spec = pl.BlockSpec((batch_tile, out_p), lambda i: (i, 0))
        kernel = _mlp_fused_kernel
        scratch = []
        dims = ("parallel",)
    else:
        n_k = hid_p // hid_tile
        grid = (n_b, n_k)
        in_specs = [
            pl.BlockSpec((batch_tile, in_p), lambda i, k: (i, 0)),
            pl.BlockSpec((in_p, hid_tile), lambda i, k: (0, k)),
            pl.BlockSpec((1, hid_tile), lambda i, k: (0, k)),
            pl.BlockSpec((hid_tile, out_p), lambda i, k: (k, 0)),
            const_spec((1, out_p), lambda i, k: (0, 0)),
        ]
        out_spec = pl.BlockSpec((batch_tile, out_p), lambda i, k: (i, 0))
        kernel = _mlp_ktiled_kernel
        scratch = [pltpu.VMEM((batch_tile, out_p), jnp.float32)]
        dims = ("parallel", "arbitrary")   # reduction axis last

    return pl.pallas_call(
        kernel,
        out_shape=jax.ShapeDtypeStruct((B_pad, out_p), out_dtype),
        grid=grid,
        in_specs=in_specs,
        out_specs=out_spec,
        scratch_shapes=scratch,
        compiler_params=pltpu.CompilerParams(
            dimension_semantics=dims,
            vmem_limit_bytes=vmem_limit),
    )(x_p, w1_p, b1_p, w2_p, b2_p)


# ----------------------------------------------------------------------------
# Public API
# ----------------------------------------------------------------------------
def _prepare_params(w1, b1, w2, b2, compute_dtype):
    """Pad feature dims to lane multiples (128) and cast weights once."""
    in_size, hidden = w1.shape
    out_size = w2.shape[1]
    in_p = _round_up(in_size, _LANE)
    hid_p = _round_up(hidden, _LANE)
    out_p = _round_up(out_size, _LANE)
    w1_p = _pad2d(w1, in_p, hid_p).astype(compute_dtype)
    w2_p = _pad2d(w2, hid_p, out_p).astype(compute_dtype)
    # Biases stay f32 (v5e VPU has no bf16 ALU; accumulation is f32 anyway).
    b1_p = _pad2d(b1.reshape(1, hidden).astype(jnp.float32), 1, hid_p)
    b2_p = _pad2d(b2.reshape(1, out_size).astype(jnp.float32), 1, out_p)
    return w1_p, b1_p, w2_p, b2_p, out_size


def _forward_padded_params(x, w1_p, b1_p, w2_p, b2_p, out_size, compute_dtype,
                           single_buf, batch_tile=None, hidden_tile=None):
    B = x.shape[0]
    in_p, hid_p = w1_p.shape
    out_p = w2_p.shape[1]
    out_dtype = x.dtype
    cbytes = jnp.dtype(compute_dtype).itemsize
    obytes = jnp.dtype(out_dtype).itemsize

    num_tc, mxu_rows = _device_traits()
    B8 = _round_up(B, _SUBLANE)
    bt, ht = _select_tiling(B8, in_p, hid_p, out_p, cbytes, obytes,
                            num_tc, mxu_rows, single_buf)
    if batch_tile is not None:
        bt = max(_SUBLANE, _round_up(int(batch_tile), _SUBLANE))
    if hidden_tile is not None:
        ht = max(_LANE, _round_up(int(hidden_tile), _LANE))
        if ht >= hid_p:
            ht = None
    B_pad = _round_up(B8, bt)

    # Hidden (K) tiling: padded hidden dim must be a multiple of the tile
    # (extra zero columns are numerically inert).
    if ht is not None and hid_p % ht:
        hid_p = _round_up(hid_p, ht)
        w1_p = _pad2d(w1_p, in_p, hid_p)
        b1_p = _pad2d(b1_p, 1, hid_p)
        w2_p = _pad2d(w2_p, hid_p, out_p)

    x_p = _pad2d(x, B_pad, in_p).astype(compute_dtype)

    est = _vmem_bytes(bt, in_p, ht if ht is not None else hid_p, out_p,
                      cbytes, obytes, ktiled=ht is not None,
                      single_buf_w=single_buf)
    vmem_limit = int(min(_VMEM_CEIL, max(_VMEM_FLOOR, int(est * 1.5) + (2 << 20))))

    out_padded = _pallas_mlp(
        x_p, w1_p, b1_p, w2_p, b2_p,
        batch_tile=bt, hid_tile=ht, out_dtype=out_dtype,
        single_buffer_consts=single_buf, vmem_limit=vmem_limit)

    if B_pad == B and out_p == out_size:
        return out_padded          # slice would be a no-op: skip the HBM pass
    return out_padded[:B, :out_size]


def neural_net_forward(x, w1, b1, w2, b2, *, use_bf16=False,
                       batch_tile=None, hidden_tile=None):
    """Pallas implementation of NeuralNet.forward.

    x  : [B, input_size]
    w1 : [input_size, hidden_size]   (transposed vs PyTorch's [out, in])
    b1 : [hidden_size]
    w2 : [hidden_size, output_size]
    b2 : [output_size]
    returns [B, output_size] in x.dtype.

    Note: accumulation is always f32; if x is bf16 (or use_bf16=True) the
    layer-1 activation is carried in bf16 between the two matmuls.
    """
    compute_dtype = jnp.bfloat16 if use_bf16 else x.dtype
    w1_p, b1_p, w2_p, b2_p, out_size = _prepare_params(w1, b1, w2, b2, compute_dtype)
    return _forward_padded_params(x, w1_p, b1_p, w2_p, b2_p, out_size,
                                  compute_dtype, _buffered_one_supported(),
                                  batch_tile=batch_tile, hidden_tile=hidden_tile)


def make_neural_net(w1, b1, w2, b2, *, use_bf16=False):
    """Pre-pads / pre-casts the parameters ONCE and returns a jitted forward(x).

    This removes the per-call weight pad/cast HBM pass and keeps the x
    pad/cast + output slice fused with the pallas_call under one jit.
    """
    compute_dtype = jnp.bfloat16 if use_bf16 else w1.dtype
    w1_p, b1_p, w2_p, b2_p, out_size = _prepare_params(w1, b1, w2, b2, compute_dtype)
    single_buf = _buffered_one_supported()

    @jax.jit
    def forward(x):
        return _forward_padded_params(x, w1_p, b1_p, w2_p, b2_p, out_size,
                                      compute_dtype, single_buf)

    return forward


# ----------------------------------------------------------------------------
# Self-test
# ----------------------------------------------------------------------------
if __name__ == "__main__":
    key = jax.random.PRNGKey(0)

    def init_params(k, input_size, hidden_size, output_size):
        kw1, kb1, kw2, kb2 = jax.random.split(k, 4)
        bound1 = 1.0 / (input_size ** 0.5)
        w1 = jax.random.uniform(kw1, (input_size, hidden_size),
                                minval=-bound1, maxval=bound1, dtype=jnp.float32)
        b1 = jax.random.uniform(kb1, (hidden_size,),
                                minval=-bound1, maxval=bound1, dtype=jnp.float32)
        bound2 = 1.0 / (hidden_size ** 0.5)
        w2 = jax.random.uniform(kw2, (hidden_size, output_size),
                                minval=-bound2, maxval=bound2, dtype=jnp.float32)
        b2 = jax.random.uniform(kb2, (output_size,),
                                minval=-bound2, maxval=bound2, dtype=jnp.float32)
        return w1, b1, w2, b2

    def ref_forward(x, w1, b1, w2, b2):
        return jnp.maximum(x @ w1 + b1, 0.0) @ w2 + b2

    kx, kp, kx2, kp2 = jax.random.split(key, 4)

    # ---- case 1: fused path, f32; B=24 exercises batch/feature padding ------
    B, in_s, hid_s, out_s = 24, 32, 64, 16
    w1, b1, w2, b2 = init_params(kp, in_s, hid_s, out_s)
    x = jax.random.normal(kx, (B, in_s), dtype=jnp.float32)
    ref = ref_forward(x, w1, b1, w2, b2)

    out = jax.block_until_ready(neural_net_forward(x, w1, b1, w2, b2))
    assert out.shape == (B, out_s)
    assert jnp.allclose(out, ref, atol=1e-5, rtol=1e-5)

    # Factory path: weights padded/cast once, forward jitted.
    fwd = make_neural_net(w1, b1, w2, b2)
    out_jit = jax.block_until_ready(fwd(x))
    assert out_jit.shape == (B, out_s)
    assert jnp.allclose(out_jit, ref, atol=1e-5, rtol=1e-5)

    # bf16 compute path (f32 accumulation) — looser tolerance.
    out_bf16 = jax.block_until_ready(
        neural_net_forward(x, w1, b1, w2, b2, use_bf16=True))
    assert out_bf16.shape == (B, out_s)
    assert jnp.allclose(out_bf16, ref, atol=5e-2, rtol=5e-2)

    # ---- case 2: forced hidden (K) tiling path ------------------------------
    B2, in2, hid2, out2 = 16, 64, 256, 48
    w1b, b1b, w2b, b2b = init_params(kp2, in2, hid2, out2)
    x2 = jax.random.normal(kx2, (B2, in2), dtype=jnp.float32)
    ref2 = ref_forward(x2, w1b, b1b, w2b, b2b)

    out2_k = jax.block_until_ready(
        neural_net_forward(x2, w1b, b1b, w2b, b2b, hidden_tile=128))
    assert out2_k.shape == (B2, out2)
    assert jnp.allclose(out2_k, ref2, atol=1e-4, rtol=1e-4)

    print("KERNEL_OK")
</pallas_src>

<mosaic_0001>
module attributes {stable_mosaic.version = 11 : i64} {
  func.func @k(%arg0: i32, %arg1: memref<8x128xf32, #tpu.memory_space<vmem>>, %arg2: memref<8x128xf32, #tpu.memory_space<vmem>>) attributes {dimension_semantics = [#tpu.dimension_semantics<arbitrary>], iteration_bounds = array<i64: 1>, scalar_prefetch = 0 : i64, scratch_operands = 0 : i64, tpu.core_type = #tpu.core_type<tc>, window_params = [{pipeline_mode = #tpu.pipeline_mode<synchronous>, transform_indices = @transform_0, window_bounds = array<i64: 8, 128>}, {pipeline_mode = #tpu.pipeline_mode<synchronous>, transform_indices = @transform_1, window_bounds = array<i64: 8, 128>}]} {
    %c0 = arith.constant 0 : index
    %c0_0 = arith.constant 0 : index
    %0 = vector.load %arg1[%c0, %c0_0] : memref<8x128xf32, #tpu.memory_space<vmem>>, vector<8x128xf32>
    %c0_1 = arith.constant 0 : index
    %c0_2 = arith.constant 0 : index
    %1 = vector.load %arg2[%c0_1, %c0_2] : memref<8x128xf32, #tpu.memory_space<vmem>>, vector<8x128xf32>
    tpu.vector_store %arg2[%c0_1, %c0_2], %0 {strides = array<i32>} : memref<8x128xf32, #tpu.memory_space<vmem>>, vector<8x128xf32>,
    return
  }
  func.func @transform_0(%arg0: i32) -> (i32, i32) {
    %c0_i32 = arith.constant 0 : i32
    %c0_i32_0 = arith.constant 0 : i32
    %c0_i32_1 = arith.constant 0 : i32
    return %c0_i32, %c0_i32_0 : i32, i32
  }
  func.func @transform_1(%arg0: i32) -> (i32, i32) {
    %c0_i32 = arith.constant 0 : i32
    %c0_i32_0 = arith.constant 0 : i32
    %c0_i32_1 = arith.constant 0 : i32
    return %c0_i32, %c0_i32_0 : i32, i32
  }
}

module attributes {stable_mosaic.version = 11 : i64} {
  func.func @_mlp_fused_kernel(%arg0: i32, %arg1: memref<24x128xf32, #tpu.memory_space<vmem>>, %arg2: memref<128x128xf32, #tpu.memory_space<vmem>>, %arg3: memref<1x128xf32, #tpu.memory_space<vmem>>, %arg4: memref<128x128xf32, #tpu.memory_space<vmem>>, %arg5: memref<1x128xf32, #tpu.memory_space<vmem>>, %arg6: memref<24x128xf32, #tpu.memory_space<vmem>>) attributes {dimension_semantics = [#tpu.dimension_semantics<parallel>], iteration_bounds = array<i64: 1>, scalar_prefetch = 0 : i64, scratch_operands = 0 : i64, tpu.core_type = #tpu.core_type<tc>, window_params = [{transform_indices = @transform_0, window_bounds = array<i64: 24, 128>}, {pipeline_mode = #tpu.pipeline_mode<synchronous>, transform_indices = @transform_1, window_bounds = array<i64: 128, 128>}, {pipeline_mode = #tpu.pipeline_mode<synchronous>, transform_indices = @transform_2, window_bounds = array<i64: 1, 128>}, {pipeline_mode = #tpu.pipeline_mode<synchronous>, transform_indices = @transform_3, window_bounds = array<i64: 128, 128>}, {pipeline_mode = #tpu.pipeline_mode<synchronous>, transform_indices = @transform_4, window_bounds = array<i64: 1, 128>}, {transform_indices = @transform_5, window_bounds = array<i64: 24, 128>}]} {
    %c0 = arith.constant 0 : index
    %c0_0 = arith.constant 0 : index
    %0 = vector.load %arg1[%c0, %c0_0] : memref<24x128xf32, #tpu.memory_space<vmem>>, vector<24x128xf32>
    %c0_1 = arith.constant 0 : index
    %c0_2 = arith.constant 0 : index
    %1 = vector.load %arg2[%c0_1, %c0_2] : memref<128x128xf32, #tpu.memory_space<vmem>>, vector<128x128xf32>
    %cst = arith.constant dense<0.000000e+00> : vector<24x128xf32>
    %2 = tpu.matmul %0, %1, %cst {dimension_numbers = #tpu.dot_dimension_numbers<[1], [0], [0], [1], [0, 0, 1, 1], [], []>} : vector<24x128xf32>, vector<128x128xf32>, vector<24x128xf32> -> vector<24x128xf32>
    %c0_3 = arith.constant 0 : index
    %c0_4 = arith.constant 0 : index
    %3 = vector.load %arg3[%c0_3, %c0_4] : memref<1x128xf32, #tpu.memory_space<vmem>>, vector<1x128xf32>
    %4 = vector.broadcast %3 : vector<1x128xf32> to vector<24x128xf32>
    %5 = arith.addf %2, %4 : vector<24x128xf32>
    %cst_5 = arith.constant 0.000000e+00 : f32
    %6 = vector.broadcast %cst_5 : f32 to vector<24x128xf32>
    %7 = arith.maximumf %5, %6 : vector<24x128xf32>
    %c0_6 = arith.constant 0 : index
    %c0_7 = arith.constant 0 : index
    %8 = vector.load %arg4[%c0_6, %c0_7] : memref<128x128xf32, #tpu.memory_space<vmem>>, vector<128x128xf32>
    %cst_8 = arith.constant dense<0.000000e+00> : vector<24x128xf32>
    %9 = tpu.matmul %7, %8, %cst_8 {dimension_numbers = #tpu.dot_dimension_numbers<[1], [0], [0], [1], [0, 0, 1, 1], [], []>} : vector<24x128xf32>, vector<128x128xf32>, vector<24x128xf32> -> vector<24x128xf32>
    %c0_9 = arith.constant 0 : index
    %c0_10 = arith.constant 0 : index
    %10 = vector.load %arg5[%c0_9, %c0_10] : memref<1x128xf32, #tpu.memory_space<vmem>>, vector<1x128xf32>
    %11 = vector.broadcast %10 : vector<1x128xf32> to vector<24x128xf32>
    %12 = arith.addf %9, %11 : vector<24x128xf32>
    %c0_11 = arith.constant 0 : index
    %c0_12 = arith.constant 0 : index
    %13 = vector.load %arg6[%c0_11, %c0_12] : memref<24x128xf32, #tpu.memory_space<vmem>>, vector<24x128xf32>
    tpu.vector_store %arg6[%c0_11, %c0_12], %12 {strides = array<i32>} : memref<24x128xf32, #tpu.memory_space<vmem>>, vector<24x128xf32>,
    return
  }
  func.func @transform_0(%arg0: i32) -> (i32, i32) {
    %c0_i32 = arith.constant 0 : i32
    %c0_i32_0 = arith.constant 0 : i32
    return %arg0, %c0_i32 : i32, i32
  }
  func.func @transform_1(%arg0: i32) -> (i32, i32) {
    %c0_i32 = arith.constant 0 : i32
    %c0_i32_0 = arith.constant 0 : i32
    %c0_i32_1 = arith.constant 0 : i32
    return %c0_i32, %c0_i32_0 : i32, i32
  }
  func.func @transform_2(%arg0: i32) -> (i32, i32) {
    %c0_i32 = arith.constant 0 : i32
    %c0_i32_0 = arith.constant 0 : i32
    %c0_i32_1 = arith.constant 0 : i32
    return %c0_i32, %c0_i32_0 : i32, i32
  }
  func.func @transform_3(%arg0: i32) -> (i32, i32) {
    %c0_i32 = arith.constant 0 : i32
    %c0_i32_0 = arith.constant 0 : i32
    %c0_i32_1 = arith.constant 0 : i32
    return %c0_i32, %c0_i32_0 : i32, i32
  }
  func.func @transform_4(%arg0: i32) -> (i32, i32) {
    %c0_i32 = arith.constant 0 : i32
    %c0_i32_0 = arith.constant 0 : i32
    %c0_i32_1 = arith.constant 0 : i32
    return %c0_i32, %c0_i32_0 : i32, i32
  }
  func.func @transform_5(%arg0: i32) -> (i32, i32) {
    %c0_i32 = arith.constant 0 : i32
    %c0_i32_0 = arith.constant 0 : i32
    return %arg0, %c0_i32 : i32, i32
  }
}

</mosaic_0001>

<bundles_post_ra>
// kernel: tpu_custom_call.1
= control target key start
LH: loop header
LB: loop body
LE: loop exit
PB: predicated region body
PF: predicated region fallthrough
CT: control target
= control target key end

     0   :  { %6 = vsyncpa [#allocation3], 0  ;;  %s114_s0 = inlined_call_operand.hbm [shape: f32[8,128], index: 0, kind: input, shape index: {}]   ;;  %s115_s1 = inlined_call_operand.hbm [shape: f32[8,128], index: 1, kind: output, shape index: {}]  }
   0x1   :  { %7 = vsyncpa [#allocation4], 0  ;;  %s13_s8 = sshll.u32 %s114_s0, 4  ;;  %s96_s9 = smov [#allocation2]   ;;  %s14_s8 = int_to_ptr.hbm [resolvable:$true] %s13_s8 }
   0x2   :  { %s15_s10 = sshll.u32 %s96_s9, 4  ;;  %s16_s10 = int_to_ptr.vmem [resolvable:$true] %s15_s10 }
   0x3   :  { %18 = dma.hbm_to_vmem [thread:$0]  %s14_s8, 128, %s16_s10, [#allocation3]  }
   0x4   :  { %92 = dma.done.wait [#allocation3], 128  }
   0x5   :  { %93 = vsyncadd [#allocation3], 4294967168  ;;  %s97_s11 = smov [#allocation5]   ;;  %s32_s15 = sshll.u32 %s115_s1, 4  ;;  %v23_v0 = vld [vmem:[#allocation2] sm:$0xff]  ;;  %s33_s15 = int_to_ptr.hbm [resolvable:$true] %s32_s15 }
   0x6   :  { %s30_s12 = sshll.u32 %s97_s11, 4  ;;  %24 = vst [vmem:[#allocation5] sm:$0xff] %v23_v0  ;;  %s31_s12 = int_to_ptr.vmem [resolvable:$true] %s30_s12 }
   0x7   :  { %35 = dma.vmem_to_hbm [thread:$0]  %s31_s12, 128, %s33_s15, [#allocation4]  }
   0x8   :  { %94 = dma.done.wait [#allocation4], 128  }
   0x9   :  { %95 = vsyncadd [#allocation4], 4294967168 }
   0xa   :  { %40 = vsyncpa [#allocation3], 1 }
   0xb   :  { %41 = vsyncpa [#allocation4], 1 }

// kernel: tpu_custom_call.1
= control target key start
LH: loop header
LB: loop body
LE: loop exit
PB: predicated region body
PF: predicated region fallthrough
CT: control target
= control target key end

     0   :  { %10 = vsyncpa [#allocation3], 0  ;;  %s397_s0 = inlined_call_operand.hbm [shape: f32[24,128], index: 0, kind: input, shape index: {}]   ;;  %s398_s1 = inlined_call_operand.hbm [shape: f32[128,128], index: 1, kind: input, shape index: {}]   ;;  %s399_s2 = inlined_call_operand.vmem [shape: f32[1,128], index: 2, kind: input, shape index: {}]   ;;  %s400_s3 = inlined_call_operand.hbm [shape: f32[128,128], index: 3, kind: input, shape index: {}]   ;;  %s401_s4 = inlined_call_operand.vmem [shape: f32[1,128], index: 4, kind: input, shape index: {}]   ;;  %s402_s5 = inlined_call_operand.hbm [shape: f32[24,128], index: 5, kind: output, shape index: {}]  }
   0x1   :  { %11 = vsyncpa [#allocation6], 0 }
   0x2   :  { %12 = vsyncpa [#allocation4], 0  ;;  %s30_s20 = sshll.u32 %s398_s1, 4  ;;  %s331_s21 = smov [#allocation5]   ;;  %s31_s20 = int_to_ptr.hbm [resolvable:$true] %s30_s20 }
   0x3   :  { %s32_s22 = sshll.u32 %s331_s21, 4  ;;  %s17_s25 = sshll.u32 %s397_s0, 4  ;;  %s33_s22 = int_to_ptr.vmem [resolvable:$true] %s32_s22  ;;  %s18_s25 = int_to_ptr.hbm [resolvable:$true] %s17_s25 }
   0x4   :  { %s332_s26 = smov 128   ;;  %s333_s27 = smov 8  }
   0x5   :  { %38 = dma.hbm_to_vmem [thread:$0]  %s31_s20, 2048, %s33_s22, [#allocation6], %s332_s26, %s332_s26, %s333_s27  }
   0x6   :  { %s334_s28 = smov [#allocation2]   ;;  %s45_s1 = sshll.u32 %s400_s3, 4  ;;  %s46_s1 = int_to_ptr.hbm [resolvable:$true] %s45_s1 }
   0x7   :  { %s19_s29 = sshll.u32 %s334_s28, 4  ;;  %s335_s0 = smov [#allocation7]   ;;  %s20_s29 = int_to_ptr.vmem [resolvable:$true] %s19_s29 }
   0x8   :  { %25 = dma.hbm_to_vmem [thread:$0]  %s18_s25, 384, %s20_s29, [#allocation3], %s332_s26, %s332_s26, %s333_s27  }
   0x9   :  { %s47_s7 = sshll.u32 %s335_s0, 4  ;;  %s48_s7 = int_to_ptr.vmem [resolvable:$true] %s47_s7 }
   0xa   :  { %53 = dma.hbm_to_vmem [thread:$0]  %s46_s1, 2048, %s48_s7, [#allocation6], %s332_s26, %s332_s26, %s333_s27  }
   0xb   :  { %325 = dma.done.wait [#allocation3], 384  }
   0xc   :  { %326 = vsyncadd [#allocation3], 4294966912 }
   0xd   :  { %327 = dma.done.wait [#allocation6], 4096  }
   0xe   :  { %328 = vsyncadd [#allocation6], 4294963200  ;;  %v86_v0 = vld [vmem:[#allocation5 + $0x78] sm:$0xff]  ;;  %v85_v1 = vld [vmem:[#allocation5 + $0x70] sm:$0xff]  ;;  %s175_s14 = sshll.u32 %s402_s5, 4  ;;  %s176_s14 = int_to_ptr.hbm [resolvable:$true] %s175_s14 }
   0xf   :  { %189 = vmatpush.msra.mxu2 %v86_v0  ;;  %91 = vmatpush.msra.mxu0 %v86_v0  ;;  %v84_v2 = vld [vmem:[#allocation5 + $0x68] sm:$0xff]  ;;  %v83_v3 = vld [vmem:[#allocation5 + $0x60] sm:$0xff]  ;;  %v82_v4 = vld [vmem:[#allocation5 + $0x58] sm:$0xff] }
  0x10   :  { %v81_v5 = vld [vmem:[#allocation5 + $0x50] sm:$0xff]  ;;  %v135_v6 = vld [vmem:[#allocation7 + $0x78] sm:$0xff]  ;;  %v80_v8 = vld [vmem:[#allocation5 + $0x48] sm:$0xff] }
  0x11   :  { %190 = vmatpush.msra.mxu2 %v85_v1  ;;  %92 = vmatpush.msra.mxu0 %v85_v1  ;;  %v134_v7 = vld [vmem:[#allocation7 + $0x70] sm:$0xff]  ;;  %v133_v9 = vld [vmem:[#allocation7 + $0x68] sm:$0xff]  ;;  %v79_v10 = vld [vmem:[#allocation5 + $0x40] sm:$0xff] }
  0x12   :  { %205 = vmatpush.msra.mxu3 %v135_v6  ;;  %140 = vmatpush.msra.mxu1 %v135_v6  ;;  %v132_v11 = vld [vmem:[#allocation7 + $0x60] sm:$0xff]  ;;  %v78_v12 = vld [vmem:[#allocation5 + $0x38] sm:$0xff]  ;;  %v77_v14 = vld [vmem:[#allocation5 + $0x30] sm:$0xff] }
  0x13   :  { %191 = vmatpush.msra.mxu2 %v84_v2  ;;  %93 = vmatpush.msra.mxu0 %v84_v2  ;;  %v131_v13 = vld [vmem:[#allocation7 + $0x58] sm:$0xff]  ;;  %v130_v15 = vld [vmem:[#allocation7 + $0x50] sm:$0xff]  ;;  %v76_v16 = vld [vmem:[#allocation5 + $0x28] sm:$0xff] }
  0x14   :  { %206 = vmatpush.msra.mxu3 %v134_v7  ;;  %141 = vmatpush.msra.mxu1 %v134_v7  ;;  %v129_v17 = vld [vmem:[#allocation7 + $0x48] sm:$0xff]  ;;  %v75_v18 = vld [vmem:[#allocation5 + $0x20] sm:$0xff]  ;;  %v74_v20 = vld [vmem:[#allocation5 + $0x18] sm:$0xff] }
  0x15   :  { %192 = vmatpush.msra.mxu2 %v83_v3  ;;  %94 = vmatpush.msra.mxu0 %v83_v3  ;;  %v128_v19 = vld [vmem:[#allocation7 + $0x40] sm:$0xff]  ;;  %v127_v21 = vld [vmem:[#allocation7 + $0x38] sm:$0xff]  ;;  %v73_v22 = vld [vmem:[#allocation5 + $0x10] sm:$0xff] }
  0x16   :  { %207 = vmatpush.msra.mxu3 %v133_v9  ;;  %142 = vmatpush.msra.mxu1 %v133_v9  ;;  %v126_v23 = vld [vmem:[#allocation7 + $0x30] sm:$0xff]  ;;  %v72_v24 = vld [vmem:[#allocation5 + $0x8] sm:$0xff]  ;;  %v71_v26 = vld [vmem:[#allocation5] sm:$0xff] }
  0x17   :  { %193 = vmatpush.msra.mxu2 %v82_v4  ;;  %95 = vmatpush.msra.mxu0 %v82_v4  ;;  %v125_v25 = vld [vmem:[#allocation7 + $0x28] sm:$0xff]  ;;  %v69_v27 = vld [vmem:[#allocation2 + $0x8] sm:$0xff]  ;;  %v124_v29 = vld [vmem:[#allocation7 + $0x20] sm:$0xff] }
  0x18   :  { %208 = vmatpush.msra.mxu3 %v132_v11  ;;  %143 = vmatpush.msra.mxu1 %v132_v11  ;;  %v68_v28 = vld [vmem:[#allocation2] sm:$0xff]  ;;  %v123_v30 = vld [vmem:[#allocation7 + $0x18] sm:$0xff]  ;;  %v122_v32 = vld [vmem:[#allocation7 + $0x10] sm:$0xff] }
  0x19   :  { %194 = vmatpush.msra.mxu2 %v81_v5  ;;  %96 = vmatpush.msra.mxu0 %v81_v5  ;;  %v70_v31 = vld [vmem:[#allocation2 + $0x10] sm:$0xff]  ;;  %v121_v33 = vld [vmem:[#allocation7 + $0x8] sm:$0xff]  ;;  %v120_v34 = vld [vmem:[#allocation7] sm:$0xff] }
  0x1a   :  { %209 = vmatpush.msra.mxu3 %v131_v13  ;;  %144 = vmatpush.msra.mxu1 %v131_v13  ;;  %v227_v35 = vld [vmem:[%s399_s2] ss:$0 sm:$0xff]  ;;  %s336_s2 = smov [#allocation8]  }
  0x1b   :  { %195 = vmatpush.msra.mxu2 %v80_v8  ;;  %97 = vmatpush.msra.mxu0 %v80_v8  ;;  %v228_v45 = vld [vmem:[%s401_s4] ss:$0 sm:$0xff]  ;;  %s173_s11 = sshll.u32 %s336_s2, 4  ;;  %s174_s11 = int_to_ptr.vmem [resolvable:$true] %s173_s11 }
  0x1c   :  { %210 = vmatpush.msra.mxu3 %v130_v15  ;;  %145 = vmatpush.msra.mxu1 %v130_v15 }
  0x1d   :  { %196 = vmatpush.msra.mxu2 %v79_v10  ;;  %98 = vmatpush.msra.mxu0 %v79_v10 }
  0x1e   :  { %211 = vmatpush.msra.mxu3 %v129_v17  ;;  %146 = vmatpush.msra.mxu1 %v129_v17 }
  0x1f   :  { %197 = vmatpush.msra.mxu2 %v78_v12  ;;  %99 = vmatpush.msra.mxu0 %v78_v12 }
  0x20   :  { %212 = vmatpush.msra.mxu3 %v128_v19  ;;  %147 = vmatpush.msra.mxu1 %v128_v19 }
  0x21   :  { %198 = vmatpush.msra.mxu2 %v77_v14  ;;  %100 = vmatpush.msra.mxu0 %v77_v14 }
  0x22   :  { %213 = vmatpush.msra.mxu3 %v127_v21  ;;  %148 = vmatpush.msra.mxu1 %v127_v21 }
  0x23   :  { %199 = vmatpush.msra.mxu2 %v76_v16  ;;  %101 = vmatpush.msra.mxu0 %v76_v16 }
  0x24   :  { %214 = vmatpush.msra.mxu3 %v126_v23  ;;  %149 = vmatpush.msra.mxu1 %v126_v23 }
  0x25   :  { %200 = vmatpush.msra.mxu2 %v75_v18  ;;  %102 = vmatpush.msra.mxu0 %v75_v18 }
  0x26   :  { %215 = vmatpush.msra.mxu3 %v125_v25  ;;  %150 = vmatpush.msra.mxu1 %v125_v25 }
  0x27   :  { %201 = vmatpush.msra.mxu2 %v74_v20  ;;  %103 = vmatpush.msra.mxu0 %v74_v20 }
  0x28   :  { %216 = vmatpush.msra.mxu3 %v124_v29  ;;  %151 = vmatpush.msra.mxu1 %v124_v29 }
  0x29   :  { %202 = vmatpush.msra.mxu2 %v73_v22  ;;  %104 = vmatpush.msra.mxu0 %v73_v22 }
  0x2a   :  { %217 = vmatpush.msra.mxu3 %v123_v30  ;;  %152 = vmatpush.msra.mxu1 %v123_v30 }
  0x2b   :  { %203 = vmatpush.msra.mxu2 %v72_v24  ;;  %105 = vmatpush.msra.mxu0 %v72_v24 }
  0x2c   :  { %218 = vmatpush.msra.mxu3 %v122_v32  ;;  %153 = vmatpush.msra.mxu1 %v122_v32 }
  0x2d   :  { %204 = vmatpush.msra.mxu2 %v71_v26  ;;  %106 = vmatpush.msra.mxu0 %v71_v26 }
  0x2e   :  { %110 = vmatmul.f32.vlgmr.msra.gmra.mxu2 %v69_v27  ;;  %107 = vmatmul.f32.vlgmr.msra.gmra.mxu0 %v68_v28 }
  0x2f   :  { %219 = vmatpush.msra.mxu3 %v121_v33  ;;  %154 = vmatpush.msra.mxu1 %v121_v33 }
  0x31   :  { %220 = vmatpush.msra.mxu3 %v120_v34  ;;  %155 = vmatpush.msra.mxu1 %v120_v34 }
  0x36   :  { %113 = vmatmul.f32.gmra.mxu2 %v70_v31 }
  0xab   :  { %v108_v36 = vpop.f32.mrf.mxu0 }
  0xac   :  { %v109_v37 = vadd.f32 %v227_v35, %v108_v36 }
  0xae   :  { %v117_v38 = vmax.f32 %v109_v37, 0.0 }
  0xb0   :  { %156 = vmatmul.f32.vlgmr.msra.gmra.mxu1 %v117_v38 }
  0xb1   :  { %v111_v39 = vpop.f32.mrf.mxu2 }
  0xb2   :  { %v112_v40 = vadd.f32 %v227_v35, %v111_v39 }
  0xb4   :  { %v118_v41 = vmax.f32 %v112_v40, 0.0 }
  0xb6   :  { %159 = vmatmul.f32.vlgmr.msra.gmra.mxu3 %v118_v41 }
  0xb9   :  { %v114_v42 = vpop.f32.mrf.mxu2 }
  0xba   :  { %v115_v43 = vadd.f32 %v227_v35, %v114_v42 }
  0xbc   :  { %v119_v44 = vmax.f32 %v115_v43, 0.0 }
  0xbe   :  { %162 = vmatmul.f32.gmra.mxu3 %v119_v44 }
 0x12d   :  { %v157_v46 = vpop.f32.mrf.mxu1 }
 0x12e   :  { %v158_v47 = vadd.f32 %v228_v45, %v157_v46 }
 0x130   :  { %166 = vst [vmem:[#allocation8] sm:$0xff] %v158_v47 }
 0x139   :  { %v160_v48 = vpop.f32.mrf.mxu3 }
 0x13a   :  { %v161_v49 = vadd.f32 %v228_v45, %v160_v48 }
 0x13c   :  { %167 = vst [vmem:[#allocation8 + $0x8] sm:$0xff] %v161_v49 }
 0x141   :  { %v163_v50 = vpop.f32.mrf.mxu3 }
 0x142   :  { %v164_v51 = vadd.f32 %v228_v45, %v163_v50 }
 0x144   :  { %168 = vst [vmem:[#allocation8 + $0x10] sm:$0xff] %v164_v51 }
 0x145   :  { %181 = dma.vmem_to_hbm [thread:$0]  %s174_s11, 384, %s176_s14, [#allocation4], %s332_s26, %s332_s26, %s333_s27  }
 0x146   :  { %329 = dma.done.wait [#allocation4], 384  }
 0x147   :  { %330 = vsyncadd [#allocation4], 4294966912 }
 0x148   :  { %186 = vsyncpa [#allocation3], 1 }
 0x149   :  { %187 = vsyncpa [#allocation6], 1 }
 0x14a   :  { %188 = vsyncpa [#allocation4], 1 }

</bundles_post_ra>
